<compile_context>
chip_gen: v7x
topology: tpu7x:2x2x1
jax: 0.10.0
libtpu: 0.0.40
codegen_flags: <defaults>
</compile_context>

<pallas_src>
import functools

import jax
import jax.numpy as jnp
from jax.experimental import pallas as pl
from jax.experimental.pallas import tpu as pltpu


def _round_up(n, m):
    return ((n + m - 1) // m) * m


def _cdiv(a, b):
    return -(-a // b)


def _dueling_dqn_kernel(x_ref, w1_ref, b1_ref, w2_ref, b2_ref,
                        wh_ref, bh_ref, q_ref):
    """One batch tile of the fused forward pass.

    x:  (TB, S)        bf16
    w1: (S, 512)       bf16    b1: (1, 512)  bf16
    w2: (512, 128)     bf16    b2: (1, 128)  bf16
    wh: (128, A)       f32     bh: (1, A)    f32   (fused value+adv-mean head)
    q:  (TB, A)        f32     (unpadded, A = num_vehicles*(num_rsu+1))
    """
    # fc1: MXU bf16 matmul, f32 accumulation, bf16 bias+ReLU epilogue.
    h1 = jnp.dot(x_ref[...], w1_ref[...], preferred_element_type=jnp.float32)
    h1 = jnp.maximum(h1.astype(jnp.bfloat16) + b1_ref[...], 0.0)

    # fc2: same structure.
    h2 = jnp.dot(h1, w2_ref[...], preferred_element_type=jnp.float32)
    h2 = jnp.maximum(h2.astype(jnp.bfloat16) + b2_ref[...], 0.0)

    # Fused dueling head: q = V + (A - mean_group(A)) folded into one matmul.
    # Head weights are f32 so per-action differences (argmax) stay accurate.
    q_ref[...] = jnp.dot(h2.astype(jnp.float32), wh_ref[...],
                         preferred_element_type=jnp.float32) + bh_ref[...]


def prepare_params(params, num_vehicles, num_rsu):
    """Fold value stream + per-group advantage mean into one f32 head and
    cast the MXU operands (w1/w2) and epilogue biases (b1/b2) to bf16.

    Done once per model; returns only arrays (no Python ints) so the result
    can safely be passed through jit boundaries.
    """
    w1, b1, w2, b2, wv, bv, wa, ba = params
    group = num_rsu + 1
    adv_dim = num_vehicles * group

    # Block-diagonal averaging matrix G (A, A): G[i, j] = 1/group if same group.
    gi = jnp.arange(adv_dim) // group
    g = (gi[:, None] == gi[None, :]).astype(jnp.float32) / float(group)
    m = jnp.eye(adv_dim, dtype=jnp.float32) - g            # (A, A)

    ones_row = jnp.ones((1, adv_dim), jnp.float32)
    w_head = wa @ m + wv @ ones_row                        # (128, A) f32
    b_head = ba @ m + bv * ones_row                        # (1, A)   f32

    return (w1.astype(jnp.bfloat16), b1.astype(jnp.bfloat16),
            w2.astype(jnp.bfloat16), b2.astype(jnp.bfloat16),
            w_head.astype(jnp.float32), b_head.astype(jnp.float32))


def dueling_dqn_forward(x, prepared, num_vehicles, num_rsu):
    """Runs the Pallas kernel; returns (B, num_vehicles, num_rsu+1) Q-values."""
    w1, b1, w2, b2, w_head, b_head = prepared
    batch, state_dim = x.shape
    group = num_rsu + 1
    adv_dim = num_vehicles * group
    hidden1 = w1.shape[1]
    hidden2 = w2.shape[1]
    assert w_head.shape == (hidden2, adv_dim)

    # Adaptive batch tiling: multiples of 16, cap 1024, bounded padding, and
    # >= 2 grid steps when batch >= 32 so v7x can shard across its 2 TCs.
    tb_cap = 1024
    b16 = _round_up(batch, 16)
    n_tiles = max(1, _cdiv(b16, tb_cap))
    if batch >= 32:
        n_tiles = max(n_tiles, 2)
    tb = _round_up(_cdiv(b16, n_tiles), 16)
    b_pad = tb * n_tiles

    x_p = x.astype(jnp.bfloat16)
    if b_pad != batch:
        x_p = jnp.pad(x_p, ((0, b_pad - batch), (0, 0)))
    grid = (n_tiles,)

    const = lambda i: (0, 0)   # weights/biases resident across grid iterations
    in_specs = [
        pl.BlockSpec((tb, state_dim), lambda i: (i, 0)),   # x tile
        pl.BlockSpec((state_dim, hidden1), const),         # w1
        pl.BlockSpec((1, hidden1), const),                 # b1
        pl.BlockSpec((hidden1, hidden2), const),           # w2
        pl.BlockSpec((1, hidden2), const),                 # b2
        pl.BlockSpec((hidden2, adv_dim), const),           # fused head W (f32)
        pl.BlockSpec((1, adv_dim), const),                 # fused head b (f32)
    ]
    # Unpadded output block: last dim == full array extent (legal, and ~10x
    # fewer output bytes than padding to 128 lanes).
    out_specs = pl.BlockSpec((tb, adv_dim), lambda i: (i, 0))

    flops = int(2 * b_pad * (state_dim * hidden1 + hidden1 * hidden2
                             + hidden2 * adv_dim))
    bytes_accessed = int(b_pad * state_dim * 2                  # x (bf16)
                         + (state_dim * hidden1 + hidden1 * hidden2) * 2
                         + hidden2 * adv_dim * 4                # head (f32)
                         + b_pad * adv_dim * 4)                 # q out (f32)

    q_full = pl.pallas_call(
        _dueling_dqn_kernel,
        out_shape=jax.ShapeDtypeStruct((b_pad, adv_dim), jnp.float32),
        grid=grid,
        in_specs=in_specs,
        out_specs=out_specs,
        compiler_params=pltpu.CompilerParams(
            dimension_semantics=("parallel",)),
        cost_estimate=pl.CostEstimate(flops=flops, transcendentals=0,
                                      bytes_accessed=bytes_accessed),
    )(x_p, w1, b1, w2, b2, w_head, b_head)

    q = q_full[:batch]
    return q.reshape(batch, num_vehicles, group)


def init_params(key, state_dim, num_vehicles, num_rsu):
    """Deterministic synthetic parameters (weights stored as (in, out))."""
    adv_dim = num_vehicles * (num_rsu + 1)
    keys = jax.random.split(key, 8)

    def lin(kw, kb, fan_in, fan_out):
        bound = 1.0 / jnp.sqrt(float(fan_in))
        w = jax.random.uniform(kw, (fan_in, fan_out), jnp.float32, -bound, bound)
        b = jax.random.uniform(kb, (1, fan_out), jnp.float32, -bound, bound)
        return w, b

    w1, b1 = lin(keys[0], keys[1], state_dim, 512)
    w2, b2 = lin(keys[2], keys[3], 512, 128)
    wv, bv = lin(keys[4], keys[5], 128, 1)
    wa, ba = lin(keys[6], keys[7], 128, adv_dim)
    return (w1, b1, w2, b2, wv, bv, wa, ba)


def reference_forward(x, params, num_vehicles, num_rsu):
    """Pure-JAX f32 reference mirroring the PyTorch forward exactly."""
    w1, b1, w2, b2, wv, bv, wa, ba = params
    h1 = jnp.maximum(x @ w1 + b1, 0.0)
    h2 = jnp.maximum(h1 @ w2 + b2, 0.0)
    value = (h2 @ wv + bv)[:, :, None]                       # (B, 1, 1)
    adv = (h2 @ wa + ba).reshape(-1, num_vehicles, num_rsu + 1)
    return value + (adv - adv.mean(axis=2, keepdims=True))


if __name__ == "__main__":
    # Small shapes consistent with the module's forward.
    batch = 2
    state_dim = 32
    num_vehicles = 4
    num_rsu = 2

    key = jax.random.PRNGKey(0)
    k_x, k_p = jax.random.split(key)
    x = jax.random.normal(k_x, (batch, state_dim), jnp.float32)
    params = init_params(k_p, state_dim, num_vehicles, num_rsu)

    # Hoisted (once-per-model) fused-head construction + bf16 casts.
    prepared = prepare_params(params, num_vehicles, num_rsu)
    prepared = jax.block_until_ready(prepared)

    fwd = jax.jit(functools.partial(dueling_dqn_forward,
                                    num_vehicles=num_vehicles,
                                    num_rsu=num_rsu))
    q = fwd(x, prepared)
    q = jax.block_until_ready(q)

    q_ref = reference_forward(x, params, num_vehicles, num_rsu)
    assert q.shape == (batch, num_vehicles, num_rsu + 1)

    # bf16 MXU operands / epilogue vs f32 reference: loose value tolerance.
    assert jnp.allclose(q, q_ref, atol=3e-2, rtol=3e-2), "mismatch vs reference"

    # Action-selection quality check (what matters for a DQN): the action the
    # kernel would pick must be (near-)optimal under the f32 reference.
    sel = jnp.argmax(q, axis=2)                               # (B, V)
    best_ref = jnp.max(q_ref, axis=2)                         # (B, V)
    sel_ref_val = jnp.take_along_axis(q_ref, sel[..., None], axis=2)[..., 0]
    assert jnp.all(best_ref - sel_ref_val <= 1e-2), "argmax selection degraded"

    print("KERNEL_OK")
</pallas_src>

<mosaic_0001>
module attributes {stable_mosaic.version = 11 : i64} {
  func.func @_dueling_dqn_kernel(%arg0: i32, %arg1: memref<16x32xbf16, #tpu.memory_space<vmem>>, %arg2: memref<32x512xbf16, #tpu.memory_space<vmem>>, %arg3: memref<1x512xbf16, #tpu.memory_space<vmem>>, %arg4: memref<512x128xbf16, #tpu.memory_space<vmem>>, %arg5: memref<1x128xbf16, #tpu.memory_space<vmem>>, %arg6: memref<128x12xf32, #tpu.memory_space<vmem>>, %arg7: memref<1x12xf32, #tpu.memory_space<vmem>>, %arg8: memref<16x12xf32, #tpu.memory_space<vmem>>) attributes {dimension_semantics = [#tpu.dimension_semantics<parallel>], iteration_bounds = array<i64: 1>, scalar_prefetch = 0 : i64, scratch_operands = 0 : i64, tpu.core_type = #tpu.core_type<tc>, window_params = [{transform_indices = @transform_0, window_bounds = array<i64: 16, 32>}, {pipeline_mode = #tpu.pipeline_mode<synchronous>, transform_indices = @transform_1, window_bounds = array<i64: 32, 512>}, {pipeline_mode = #tpu.pipeline_mode<synchronous>, transform_indices = @transform_2, window_bounds = array<i64: 1, 512>}, {pipeline_mode = #tpu.pipeline_mode<synchronous>, transform_indices = @transform_3, window_bounds = array<i64: 512, 128>}, {pipeline_mode = #tpu.pipeline_mode<synchronous>, transform_indices = @transform_4, window_bounds = array<i64: 1, 128>}, {pipeline_mode = #tpu.pipeline_mode<synchronous>, transform_indices = @transform_5, window_bounds = array<i64: 128, 12>}, {pipeline_mode = #tpu.pipeline_mode<synchronous>, transform_indices = @transform_6, window_bounds = array<i64: 1, 12>}, {transform_indices = @transform_7, window_bounds = array<i64: 16, 12>}]} {
    %c0 = arith.constant 0 : index
    %c0_0 = arith.constant 0 : index
    %0 = vector.load %arg1[%c0, %c0_0] : memref<16x32xbf16, #tpu.memory_space<vmem>>, vector<16x32xbf16>
    %c0_1 = arith.constant 0 : index
    %c0_2 = arith.constant 0 : index
    %1 = vector.load %arg2[%c0_1, %c0_2] : memref<32x512xbf16, #tpu.memory_space<vmem>>, vector<32x512xbf16>
    %cst = arith.constant dense<0.000000e+00> : vector<16x512xf32>
    %2 = tpu.matmul %0, %1, %cst {dimension_numbers = #tpu.dot_dimension_numbers<[1], [0], [0], [1], [0, 0, 1, 1], [], []>} : vector<16x32xbf16>, vector<32x512xbf16>, vector<16x512xf32> -> vector<16x512xf32>
    %3 = arith.truncf %2 : vector<16x512xf32> to vector<16x512xbf16>
    %c0_3 = arith.constant 0 : index
    %c0_4 = arith.constant 0 : index
    %4 = vector.load %arg3[%c0_3, %c0_4] : memref<1x512xbf16, #tpu.memory_space<vmem>>, vector<1x512xbf16>
    %5 = vector.broadcast %4 : vector<1x512xbf16> to vector<16x512xbf16>
    %6 = arith.addf %3, %5 : vector<16x512xbf16>
    %cst_5 = arith.constant 0.000000e+00 : bf16
    %7 = vector.broadcast %cst_5 : bf16 to vector<16x512xbf16>
    %8 = arith.maximumf %6, %7 : vector<16x512xbf16>
    %c0_6 = arith.constant 0 : index
    %c0_7 = arith.constant 0 : index
    %9 = vector.load %arg4[%c0_6, %c0_7] : memref<512x128xbf16, #tpu.memory_space<vmem>>, vector<512x128xbf16>
    %cst_8 = arith.constant dense<0.000000e+00> : vector<16x128xf32>
    %10 = tpu.matmul %8, %9, %cst_8 {dimension_numbers = #tpu.dot_dimension_numbers<[1], [0], [0], [1], [0, 0, 1, 1], [], []>} : vector<16x512xbf16>, vector<512x128xbf16>, vector<16x128xf32> -> vector<16x128xf32>
    %11 = arith.truncf %10 : vector<16x128xf32> to vector<16x128xbf16>
    %c0_9 = arith.constant 0 : index
    %c0_10 = arith.constant 0 : index
    %12 = vector.load %arg5[%c0_9, %c0_10] : memref<1x128xbf16, #tpu.memory_space<vmem>>, vector<1x128xbf16>
    %13 = vector.broadcast %12 : vector<1x128xbf16> to vector<16x128xbf16>
    %14 = arith.addf %11, %13 : vector<16x128xbf16>
    %cst_11 = arith.constant 0.000000e+00 : bf16
    %15 = vector.broadcast %cst_11 : bf16 to vector<16x128xbf16>
    %16 = arith.maximumf %14, %15 : vector<16x128xbf16>
    %17 = arith.extf %16 : vector<16x128xbf16> to vector<16x128xf32>
    %c0_12 = arith.constant 0 : index
    %c0_13 = arith.constant 0 : index
    %18 = vector.load %arg6[%c0_12, %c0_13] : memref<128x12xf32, #tpu.memory_space<vmem>>, vector<128x12xf32>
    %cst_14 = arith.constant dense<0.000000e+00> : vector<16x12xf32>
    %19 = tpu.matmul %17, %18, %cst_14 {dimension_numbers = #tpu.dot_dimension_numbers<[1], [0], [0], [1], [0, 0, 1, 1], [], []>} : vector<16x128xf32>, vector<128x12xf32>, vector<16x12xf32> -> vector<16x12xf32>
    %c0_15 = arith.constant 0 : index
    %c0_16 = arith.constant 0 : index
    %20 = vector.load %arg7[%c0_15, %c0_16] : memref<1x12xf32, #tpu.memory_space<vmem>>, vector<1x12xf32>
    %21 = vector.broadcast %20 : vector<1x12xf32> to vector<16x12xf32>
    %22 = arith.addf %19, %21 : vector<16x12xf32>
    %c0_17 = arith.constant 0 : index
    %c0_18 = arith.constant 0 : index
    %23 = vector.load %arg8[%c0_17, %c0_18] : memref<16x12xf32, #tpu.memory_space<vmem>>, vector<16x12xf32>
    tpu.vector_store %arg8[%c0_17, %c0_18], %22 {strides = array<i32>} : memref<16x12xf32, #tpu.memory_space<vmem>>, vector<16x12xf32>,
    return
  }
  func.func @transform_0(%arg0: i32) -> (i32, i32) {
    %c0_i32 = arith.constant 0 : i32
    %c0_i32_0 = arith.constant 0 : i32
    return %arg0, %c0_i32 : i32, i32
  }
  func.func @transform_1(%arg0: i32) -> (i32, i32) {
    %c0_i32 = arith.constant 0 : i32
    %c0_i32_0 = arith.constant 0 : i32
    %c0_i32_1 = arith.constant 0 : i32
    return %c0_i32, %c0_i32_0 : i32, i32
  }
  func.func @transform_2(%arg0: i32) -> (i32, i32) {
    %c0_i32 = arith.constant 0 : i32
    %c0_i32_0 = arith.constant 0 : i32
    %c0_i32_1 = arith.constant 0 : i32
    return %c0_i32, %c0_i32_0 : i32, i32
  }
  func.func @transform_3(%arg0: i32) -> (i32, i32) {
    %c0_i32 = arith.constant 0 : i32
    %c0_i32_0 = arith.constant 0 : i32
    %c0_i32_1 = arith.constant 0 : i32
    return %c0_i32, %c0_i32_0 : i32, i32
  }
  func.func @transform_4(%arg0: i32) -> (i32, i32) {
    %c0_i32 = arith.constant 0 : i32
    %c0_i32_0 = arith.constant 0 : i32
    %c0_i32_1 = arith.constant 0 : i32
    return %c0_i32, %c0_i32_0 : i32, i32
  }
  func.func @transform_5(%arg0: i32) -> (i32, i32) {
    %c0_i32 = arith.constant 0 : i32
    %c0_i32_0 = arith.constant 0 : i32
    %c0_i32_1 = arith.constant 0 : i32
    return %c0_i32, %c0_i32_0 : i32, i32
  }
  func.func @transform_6(%arg0: i32) -> (i32, i32) {
    %c0_i32 = arith.constant 0 : i32
    %c0_i32_0 = arith.constant 0 : i32
    %c0_i32_1 = arith.constant 0 : i32
    return %c0_i32, %c0_i32_0 : i32, i32
  }
  func.func @transform_7(%arg0: i32) -> (i32, i32) {
    %c0_i32 = arith.constant 0 : i32
    %c0_i32_0 = arith.constant 0 : i32
    return %arg0, %c0_i32 : i32, i32
  }
}

</mosaic_0001>

<bundles_post_ra>
// kernel: dueling_dqn_forward.1
= control target key start
LH: loop header
LB: loop body
LE: loop exit
PB: predicated region body
PF: predicated region fallthrough
CT: control target
= control target key end

     0   :  { %12 = vsyncpa [#allocation3], 0  ;;  %s957_s24 = smov [#allocation2]   ;;  %s1120_s0 = inlined_call_operand.vmem [shape: bf16[16,32], index: 0, kind: input, shape index: {}]   ;;  %s1121_s1 = inlined_call_operand.vmem [shape: bf16[32,512], index: 1, kind: input, shape index: {}]   ;;  %s1122_s2 = inlined_call_operand.vmem [shape: bf16[1,512], index: 2, kind: input, shape index: {}]   ;;  %s1123_s3 = inlined_call_operand.hbm [shape: bf16[512,128], index: 3, kind: input, shape index: {}]   ;;  %s1124_s4 = inlined_call_operand.vmem [shape: bf16[1,128], index: 4, kind: input, shape index: {}]   ;;  %s1125_s5 = inlined_call_operand.vmem [shape: f32[128,12], index: 5, kind: input, shape index: {}]   ;;  %s1126_s6 = inlined_call_operand.vmem [shape: f32[1,12], index: 6, kind: input, shape index: {}]   ;;  %s1127_s7 = inlined_call_operand.vmem [shape: f32[16,12], index: 7, kind: output, shape index: {}]  }
   0x1   :  { %s24_s25 = sshll.u32 %s957_s24, 4  ;;  %s933_s28 = scalar_lea.hbm %s1123_s3, 4096  ;;  %s25_s25 = int_to_ptr.vmem [resolvable:$true] %s24_s25 }
   0x2   :  { %p934_p0 = scmp.ne.s32.totalorder %s1123_s3, %s933_s28  ;;  %p937_p1 = scmp.lt.u32.totalorder %s933_s28, %s1123_s3 }
   0x4   :  { %p939_p2 = pnand %p937_p1, %p934_p0 }
   0x6   :  { %942 = shalt.err (!%p939_p2)
}
   0x7   :  { %s943_s10 = scalar_lea.vmem %s25_s25, 4096  ;;  %p948_p4 = scmp.lt.s32.totalorder %s25_s25, %s25_s25 }
   0x8   :  { %p944_p3 = scmp.ne.s32.totalorder %s25_s25, %s943_s10  ;;  %p949_p5 = scmp.lt.s32.totalorder %s943_s10, %s943_s10 }
   0xa   :  { %p950_p6 = por %p949_p5, %p948_p4 }
   0xc   :  { %p951_p7 = pnand %p950_p6, %p944_p3 }
   0xe   :  { %954 = shalt.err (!%p951_p7)
}
   0xf   :  { %s958_s11 = smov 64   ;;  %s959_s12 = smov 4  }
  0x10   :  { %30 = dma.hbm_to_vmem [thread:$0]  %s1123_s3, 4096, %s25_s25, [#allocation3], %s958_s11, %s958_s11, %s959_s12  }
  0x11   :  { %955 = dma.done.wait [#allocation3], 4096  }
  0x12   :  { %956 = vsyncadd [#allocation3], 4294963200  ;;  %v960_v0 = vmov 0   ;;  %v888_v1 = vld [vmem:[%s1121_s1 + $0x4] ss:$16 sps:$4 sm:$0xff]   ;;  %vm96_vm0 = vcmask 261120   ;;  %v203_v47 = vlaneseq }
  0x13   :  { %132 = vmatprep.mubr.bf16.mxu1 %v960_v0  ;;  %v890_v2 = vld [vmem:[%s1121_s1] ss:$16 sps:$4 sm:$0xff]   ;;  %100 = vmatprep.subr.bf16.mxu1 %v888_v1  ;;  %v891_v3 = vld [vmem:[%s1121_s1 + $0x24] ss:$16 sps:$4 sm:$0xff]   ;;  %v897_v6 = vld [vmem:[%s1121_s1 + $0xc] ss:$16 sps:$4 sm:$0xff]  }
  0x14   :  { %101 = vmatpush1.bf16.msra.mxu1 %v890_v2  ;;  %v893_v4 = vld [vmem:[%s1121_s1 + $0x20] ss:$16 sps:$4 sm:$0xff]   ;;  %v895_v7 = vld [vmem:[%s1121_s1 + $0x8] ss:$16 sps:$4 sm:$0xff]   ;;  %v900_v8 = vld [vmem:[%s1121_s1 + $0x2c] ss:$16 sps:$4 sm:$0xff]  }
  0x15   :  { %102 = vmatprep.subr.bf16.mxu1 %v891_v3  ;;  %v894_v5 = vld [vmem:[%s1120_s0] sm:$0xff]   ;;  %v901_v9 = vld [vmem:[#allocation2 + $0x40] sm:$0xff]   ;;  %v898_v11 = vld [vmem:[%s1121_s1 + $0x28] ss:$16 sps:$4 sm:$0xff]   ;;  %v961_v45 = vmov 1966171168  }
  0x16   :  { %v902_v10 = vld [vmem:[#allocation2] sm:$0xff]   ;;  %754 = vmatprep.subr.bf16.mxu0 %v901_v9  ;;  %v903_v12 = vld [vmem:[#allocation2 + $0x48] sm:$0xff]   ;;  %v905_v14 = vld [vmem:[#allocation2 + $0x50] sm:$0xff]   ;;  %v201_v46 = vunpack.c.l.s4 %v961_v45  ;;  %v204_v49 = vshrl.u32 %v203_v47, 7  ;;  %vm701_vm1 = vcmask 97280  }
  0x17   :  { %755 = vmatpush3.bf16.msra.mxu0 %v902_v10  ;;  %v904_v13 = vld [vmem:[#allocation2 + $0x8] sm:$0xff]   ;;  %v906_v15 = vld [vmem:[#allocation2 + $0xc0] sm:$0xff]   ;;  %v907_v16 = vld [vmem:[#allocation2 + $0x10] sm:$0xff]  }
  0x18   :  { %103 = vmatpush1.bf16.msra.mxu1 %v893_v4  ;;  %756 = vmatprep.subr.bf16.mxu0 %v903_v12  ;;  %v908_v17 = vld [vmem:[#allocation2 + $0x80] sm:$0xff]   ;;  %v909_v18 = vld [vmem:[#allocation2 + $0x58] sm:$0xff]   ;;  %v910_v19 = vld [vmem:[#allocation2 + $0xc8] sm:$0xff]   ;;  %v202_v48 = vunpack.c.0.s8 %v201_v46  ;;  %v1054_v56 = vsub.s32 0, %v204_v49 }
  0x19   :  { %143 = vmatprep.subr.bf16.mxu1 %v897_v6  ;;  %v911_v20 = vld [vmem:[#allocation2 + $0x18] sm:$0xff]   ;;  %v912_v21 = vld [vmem:[#allocation2 + $0x88] sm:$0xff]   ;;  %v913_v22 = vld [vmem:[#allocation2 + $0x60] sm:$0xff]  }
  0x1a   :  { %v914_v23 = vld [vmem:[#allocation2 + $0xd0] sm:$0xff]   ;;  %v915_v24 = vld [vmem:[#allocation2 + $0x20] sm:$0xff]   ;;  %v917_v26 = vld [vmem:[#allocation2 + $0x68] sm:$0xff]   ;;  %v205_v51 = vsub.s32 %v202_v48, %v204_v49 }
  0x1b   :  { %718 = vmatmul.mubr.msk.bf16.vlgmr.msra.gmra.mrb[0].mxu1 %vm96_vm0, %v894_v5  ;;  %757 = vmatpush3.bf16.msra.mxu0 %v904_v13  ;;  %v916_v25 = vld [vmem:[#allocation2 + $0x90] sm:$0xff]   ;;  %v918_v27 = vld [vmem:[#allocation2 + $0xd8] sm:$0xff]   ;;  %v919_v28 = vld [vmem:[#allocation2 + $0x28] sm:$0xff]  }
  0x1c   :  { %144 = vmatpush1.bf16.msra.mxu1 %v895_v7  ;;  %175 = vmatprep.mubr.bf16.mxu1 %v960_v0  ;;  %v920_v29 = vld [vmem:[#allocation2 + $0x98] sm:$0xff]   ;;  %v921_v30 = vld [vmem:[#allocation2 + $0x70] sm:$0xff]   ;;  %v922_v31 = vld [vmem:[#allocation2 + $0xe0] sm:$0xff]  }
  0x1d   :  { %145 = vmatprep.subr.bf16.mxu1 %v900_v8  ;;  %758 = vmatprep.subr.bf16.mxu0 %v905_v14  ;;  %v923_v32 = vld [vmem:[#allocation2 + $0x30] sm:$0xff]   ;;  %v924_v33 = vld [vmem:[#allocation2 + $0xa0] sm:$0xff]   ;;  %v925_v34 = vld [vmem:[#allocation2 + $0x78] sm:$0xff]  }
  0x1e   :  { %v926_v35 = vld [vmem:[#allocation2 + $0xe8] sm:$0xff]   ;;  %v927_v36 = vld [vmem:[#allocation2 + $0x38] sm:$0xff]   ;;  %v929_v38 = vld [vmem:[#allocation2 + $0xf0] sm:$0xff]  }
  0x1f   :  { %759 = vmatpush3.bf16.msra.mxu0 %v907_v16  ;;  %v928_v37 = vld [vmem:[#allocation2 + $0xa8] sm:$0xff]   ;;  %v930_v39 = vld [vmem:[#allocation2 + $0xb0] sm:$0xff]   ;;  %v931_v40 = vld [vmem:[#allocation2 + $0xf8] sm:$0xff]  }
  0x20   :  { %146 = vmatpush1.bf16.msra.mxu1 %v898_v11  ;;  %760 = vmatprep.subr.bf16.mxu0 %v909_v18  ;;  %v932_v41 = vld [vmem:[#allocation2 + $0xb8] sm:$0xff]   ;;  %v603_v42 = vld [vmem:[%s1125_s5] sm:$0xff]  ;;  %v605_v9 = vld [vmem:[%s1125_s5 + $0x10] sm:$0xff] }
  0x21   :  { %776 = vmatprep.subr.bf16.mxu1 %v906_v15  ;;  %v604_v43 = vld [vmem:[%s1125_s5 + $0x8] sm:$0xff]  ;;  %v720_v50 = vld.sshfl [vmem:[%s1122_s2] sm:$0x33 pattern:$0x75316420]  ;;  %v606_v10 = vld [vmem:[%s1125_s5 + $0x18] sm:$0xff] }
  0x22   :  { %v851_v44 = vpack.c.bf16 %v604_v43, %v603_v42  ;;  %v199_v52 = vcombine.high %v720_v50, %v720_v50  ;;  %v206_v53 = vrot.slane %v720_v50, %v205_v51  ;;  %v855_v16 = vpack.c.bf16 %v606_v10, %v605_v9  ;;  %v618_v42 = vld [vmem:[%s1125_s5 + $0x78] sm:$0xff]  ;;  %v591_v50 = vld [vmem:[%s1124_s4] sm:$0x1] }
  0x23   :  { %719 = vmatmul.mubr.msk.bf16.vlgmr.msra.gmra.mrb[4].mxu1 %vm96_vm0, %v894_v5  ;;  %761 = vmatpush3.bf16.msra.mxu0 %v911_v20 }
  0x24   :  { %777 = vmatpush3.bf16.msra.mxu1 %v908_v17  ;;  %762 = vmatprep.subr.bf16.mxu0 %v913_v22  ;;  %v213_v54 = vrot.slane %v199_v52, %v205_v51  ;;  %v217_v55 = vpack.i.b16 %v206_v53, %v206_v53  ;;  %v214_v61 = vcombine.high %v206_v53, %v206_v53 }
  0x25   :  { %778 = vmatprep.subr.bf16.mxu1 %v910_v19 }
  0x26   :  { %v224_v57 = vpack.i.b16 %v213_v54, %v213_v54  ;;  %v222_v60 = vrot.slane %v217_v55, %v1054_v56  ;;  %v215_v1 = vcombine.high %v213_v54, %v213_v54  ;;  %v231_v6 = vpack.i.b16 %v214_v61, %v214_v61 }
  0x27   :  { %763 = vmatpush3.bf16.msra.mxu0 %v915_v24  ;;  %v593_v55 = vpack.i.b16 %v591_v50, %v591_v50 }
  0x28   :  { %779 = vmatpush3.bf16.msra.mxu1 %v912_v21  ;;  %764 = vmatprep.subr.bf16.mxu0 %v917_v26  ;;  %v229_v63 = vrot.slane %v224_v57, %v1054_v56  ;;  %v238_v8 = vpack.i.b16 %v215_v1, %v215_v1  ;;  %v236_v14 = vrot.slane %v231_v6, %v1054_v56  ;;  %v607_v26 = vld [vmem:[%s1125_s5 + $0x20] sm:$0xff] }
  0x29   :  { %780 = vmatprep.subr.bf16.mxu1 %v914_v23  ;;  %v598_v61 = vrot.slane %v593_v55, %v1054_v56 }
  0x2a   :  { %v243_v18 = vrot.slane %v238_v8, %v1054_v56 }
  0x2b   :  { %765 = vmatpush3.bf16.msra.mxu0 %v919_v28 }
  0x2c   :  { %781 = vmatpush3.bf16.msra.mxu1 %v916_v25  ;;  %766 = vmatprep.subr.bf16.mxu0 %v921_v30  ;;  %v610_v30 = vld [vmem:[%s1125_s5 + $0x38] sm:$0xff] }
  0x2d   :  { %782 = vmatprep.subr.bf16.mxu1 %v918_v27  ;;  %v608_v27 = vld [vmem:[%s1125_s5 + $0x28] sm:$0xff] }
  0x2e   :  { %v859_v28 = vpack.c.bf16 %v608_v27, %v607_v26 }
  0x2f   :  { %767 = vmatpush3.bf16.msra.mxu0 %v923_v32  ;;  %v611_v32 = vld [vmem:[%s1125_s5 + $0x40] sm:$0xff] }
  0x30   :  { %783 = vmatpush3.bf16.msra.mxu1 %v920_v29  ;;  %768 = vmatprep.subr.bf16.mxu0 %v925_v34  ;;  %v609_v29 = vld [vmem:[%s1125_s5 + $0x30] sm:$0xff] }
  0x31   :  { %784 = vmatprep.subr.bf16.mxu1 %v922_v31  ;;  %v863_v31 = vpack.c.bf16 %v610_v30, %v609_v29 }
  0x33   :  { %769 = vmatpush3.bf16.msra.mxu0 %v927_v36  ;;  %v614_v36 = vld [vmem:[%s1125_s5 + $0x58] sm:$0xff] }
  0x34   :  { %785 = vmatpush3.bf16.msra.mxu1 %v924_v33  ;;  %852 = vmatprep.subr.bf16.mxu0 %v851_v44  ;;  %v612_v33 = vld [vmem:[%s1125_s5 + $0x48] sm:$0xff] }
  0x35   :  { %786 = vmatprep.subr.bf16.mxu1 %v926_v35  ;;  %v867_v34 = vpack.c.bf16 %v612_v33, %v611_v32  ;;  %v613_v35 = vld [vmem:[%s1125_s5 + $0x50] sm:$0xff] }
  0x38   :  { %787 = vmatpush3.bf16.msra.mxu1 %v928_v37  ;;  %v871_v37 = vpack.c.bf16 %v614_v36, %v613_v35 }
  0x39   :  { %788 = vmatprep.subr.bf16.mxu1 %v929_v38  ;;  %v615_v38 = vld [vmem:[%s1125_s5 + $0x60] sm:$0xff] }
  0x3c   :  { %789 = vmatpush3.bf16.msra.mxu1 %v930_v39  ;;  %v616_v39 = vld [vmem:[%s1125_s5 + $0x68] sm:$0xff] }
  0x3d   :  { %790 = vmatprep.subr.bf16.mxu1 %v931_v40  ;;  %v875_v40 = vpack.c.bf16 %v616_v39, %v615_v38 }
  0x40   :  { %791 = vmatpush3.bf16.msra.mxu1 %v932_v41  ;;  %v617_v41 = vld [vmem:[%s1125_s5 + $0x70] sm:$0xff] }
  0x41   :  { %v879_v43 = vpack.c.bf16 %v618_v42, %v617_v41 }
  0xee   :  { %v134_v58 = vpop.f32.mrb[0].mxu1 }
  0xef   :  { %v136_v59 = vpop.f32.mrb[1].mxu1 }
  0xf0   :  { %v138_v62 = vpop.f32.mrb[2].mxu1 }
  0xf1   :  { %v186_v2 = vpack.c.bf16 %v138_v62, %v134_v58  ;;  %v140_v3 = vpop.f32.mrb[3].mxu1 }
  0xf2   :  { %v187_v4 = vpack.c.bf16 %v140_v3, %v136_v59 }
  0xf3   :  { %v244_v5 = vadd.bf16 %v222_v60, %v186_v2 }
  0xf4   :  { %v245_v7 = vadd.bf16 %v229_v63, %v187_v4  ;;  %v753_v4 = vld [vmem:[%s1126_s6] ss:$0 sm:$0xff] }
  0xf5   :  { %v248_v15 = vmax.bf16 %v960_v0, %v244_v5 }
  0xf6   :  { %v177_v11 = vpop.f32.mrb[4].mxu1  ;;  %v249_v12 = vmax.bf16 %v960_v0, %v245_v7 }
  0xf7   :  { %v179_v13 = vpop.f32.mrb[5].mxu1 }
  0xf8   :  { %v181_v17 = vpop.f32.mrb[6].mxu1  ;;  %540 = vmatprep.mubr.bf16.mxu0 %v249_v12 }
  0xf9   :  { %v188_v19 = vpack.c.bf16 %v181_v17, %v177_v11  ;;  %v183_v20 = vpop.f32.mrb[7].mxu1  ;;  %541 = vmatmul.mubr.bf16.vlgmr.msra.gmra.mrb[0].mxu0 %v248_v15 }
  0xfa   :  { %v189_v21 = vpack.c.bf16 %v183_v20, %v179_v13  ;;  %854 = vmatpush3.bf16.msra.mxu0 %v851_v44 }
  0xfb   :  { %v246_v22 = vadd.bf16 %v236_v14, %v188_v19  ;;  %856 = vmatprep.subr.bf16.mxu0 %v855_v16 }
  0xfc   :  { %v247_v23 = vadd.bf16 %v243_v18, %v189_v21 }
  0xfd   :  { %v250_v25 = vmax.bf16 %v960_v0, %v246_v22 }
  0xfe   :  { %v251_v24 = vmax.bf16 %v960_v0, %v247_v23  ;;  %858 = vmatpush3.bf16.msra.mxu0 %v855_v16 }
  0xff   :  { %860 = vmatprep.subr.bf16.mxu0 %v859_v28 }
 0x100   :  { %581 = vmatprep.mubr.bf16.mxu1 %v251_v24 }
 0x101   :  { %582 = vmatmul.mubr.bf16.vlgmr.msra.gmra.mrb[8].mxu1 %v250_v25 }
 0x102   :  { %862 = vmatpush3.bf16.msra.mxu0 %v859_v28 }
 0x103   :  { %864 = vmatprep.subr.bf16.mxu0 %v863_v31 }
 0x106   :  { %866 = vmatpush3.bf16.msra.mxu0 %v863_v31 }
 0x107   :  { %868 = vmatprep.subr.bf16.mxu0 %v867_v34 }
 0x10a   :  { %870 = vmatpush3.bf16.msra.mxu0 %v867_v34 }
 0x10b   :  { %872 = vmatprep.subr.bf16.mxu0 %v871_v37 }
 0x10e   :  { %874 = vmatpush3.bf16.msra.mxu0 %v871_v37 }
 0x10f   :  { %876 = vmatprep.subr.bf16.mxu0 %v875_v40 }
 0x112   :  { %878 = vmatpush3.bf16.msra.mxu0 %v875_v40 }
 0x113   :  { %880 = vmatprep.subr.bf16.mxu0 %v879_v43 }
 0x116   :  { %882 = vmatpush3.bf16.msra.mxu0 %v879_v43 }
 0x1cc   :  { %v770_v44 = vpop.f32.mrb[0].mxu0 }
 0x1cd   :  { %v771_v45 = vpop.f32.mrb[1].mxu0 }
 0x1ce   :  { %v772_v46 = vadd.f32 %v771_v45, %v770_v44  ;;  %v773_v47 = vpop.f32.mrb[2].mxu0 }
 0x1cf   :  { %v774_v48 = vpop.f32.mrb[3].mxu0 }
 0x1d0   :  { %v775_v49 = vadd.f32 %v774_v48, %v773_v47 }
 0x1d4   :  { %v792_v51 = vpop.f32.mrb[8].mxu1 }
 0x1d5   :  { %v793_v52 = vpop.f32.mrb[9].mxu1 }
 0x1d6   :  { %v794_v53 = vadd.f32 %v793_v52, %v792_v51  ;;  %v795_v54 = vpop.f32.mrb[10].mxu1 }
 0x1d7   :  { %v796_v57 = vpop.f32.mrb[11].mxu1 }
 0x1d8   :  { %v584_v58 = vadd.f32 %v794_v53, %v772_v46  ;;  %v797_v59 = vadd.f32 %v796_v57, %v795_v54 }
 0x1da   :  { %v587_v60 = vadd.f32 %v797_v59, %v775_v49 }
 0x1dc   :  { %v590_v62 = vpack.c.bf16 %v587_v60, %v584_v58 }
 0x1de   :  { %v599_v63 = vadd.bf16 %v598_v61, %v590_v62 }
 0x1e0   :  { %v600_v1 = vmax.bf16 %v960_v0, %v599_v63 }
 0x1e2   :  { %v601_v2 = vunpack.c.l.bf16 %v600_v1  ;;  %v602_v3 = vunpack.c.h.bf16 %v600_v1 }
 0x1e4   :  { %848 = vmatprep.mubr.f32.mxu0 %v601_v2 }
 0x1e5   :  { %849 = vmatmul.mubr.f32.vlgmr.msra.gmra.mrb[4].mxu0 %v602_v3 }
 0x2b8   :  { %v850_v5 = vpop.f32.mrb[4].mxu0 }
 0x2b9   :  { %v698_v6 = vadd.f32 %v850_v5, %v753_v4  ;;  %v692_v7 = vpop.f32.mrb[5].mxu0 }
 0x2ba   :  { %v693_v8 = vadd.f32 %v753_v4, %v692_v7 }
 0x2bb   :  { %703 = vst.msk [vmem:[%s1127_s7 + $0x8] sm:$0xff] %vm701_vm1, %v698_v6 }
 0x2bc   :  { %702 = vst.msk [vmem:[%s1127_s7] sm:$0xff] %vm701_vm1, %v693_v8 }
 0x2bd   :  { %708 = vsyncpa [#allocation3], 1 }

</bundles_post_ra>
